<compile_context>
chip_gen: v5e
topology: v5e:2x2
jax: 0.10.0
libtpu: 0.0.40
codegen_flags: <defaults>
</compile_context>

<pallas_src>
import functools

import jax
import jax.numpy as jnp
from jax.experimental import pallas as pl
from jax.experimental.pallas import tpu as pltpu


def _round_up(x, m):
    return (x + m - 1) // m * m


def _choose_spatial_tile(hw_padded, K, c_out, max_lanes=4096,
                         stream_budget_bytes=12 * 1024 * 1024):
    """Largest 128-multiple tile that divides hw_padded and fits the budget."""
    # Bytes streamed per spatial lane per grid step, double-buffered:
    # bf16 patches block (K rows) + f32 output block (C_out rows).
    per_lane = 2 * (K * 2 + c_out * 4)
    vmem_max = max(128, (stream_budget_bytes // per_lane) // 128 * 128)
    cap = max(128, min(max_lanes, vmem_max, hw_padded))
    m = hw_padded // 128
    best = 1
    for d in range(1, m + 1):
        if m % d == 0 and 128 * d <= cap:
            best = d
    return 128 * best


# ---------------------------------------------------------------------------
# Kernel A: per-batch partial statistics WITHOUT materializing the conv.
# Since y = W @ p per spatial column p:
#     sum_pos y   = W @ (sum_pos p)
#     sum_pos y^2 = diag(W @ (sum_pos p p^T) @ W^T)
# so only the KxK Gram matrix and the K-vector of patch sums are accumulated
# (MXU work, K*K MACs/column instead of C_out*K, and no XLU reduce over a
# C_out-tall tile).  Grid: (batch "parallel", spatial tile "arbitrary").
# ---------------------------------------------------------------------------
def _stats_kernel(p_ref, g_ref, s_ref):
    @pl.when(pl.program_id(1) == 0)
    def _():
        g_ref[...] = jnp.zeros_like(g_ref)
        s_ref[...] = jnp.zeros_like(s_ref)

    p = p_ref[0].astype(jnp.float32)                       # (K, t_sp)
    g_ref[0] += jnp.dot(p, p.T, preferred_element_type=jnp.float32)
    s_ref[0] += jnp.sum(p, axis=1, keepdims=True)


# ---------------------------------------------------------------------------
# Kernel B: conv + BN + ReLU, lane-dense stores, fully parallel grid.
# ---------------------------------------------------------------------------
def _apply_kernel(p_ref, w_ref, scale_ref, shift_ref, o_ref):
    # (C_out, t_sp) = (C_out, K) @ (K, t_sp); bf16 operands, f32 accumulate.
    y = jnp.dot(w_ref[...], p_ref[0], preferred_element_type=jnp.float32)
    o_ref[0] = jnp.maximum(y * scale_ref[...] + shift_ref[...], 0.0)


def so2_on_r2_conv_block(x_nchw, weight, gamma, beta, *, N, n_channels,
                         padding=1, eps=1e-5, block_spatial=4096):
    """x_nchw: (B, C_in, H, W). weight: (C_out, C_in, kh, kw) expanded filter.
    gamma/beta: (n_channels,) per-field affine. Returns (B, C_out, H_out, W_out)."""
    B, C_in, H, W = x_nchw.shape
    C_out, C_in_w, kh, kw = weight.shape
    assert C_in_w == C_in
    assert C_out == n_channels * N

    H_out = H + 2 * padding - kh + 1
    W_out = W + 2 * padding - kw + 1
    assert H_out >= 1 and W_out >= 1
    HW = H_out * W_out
    K = C_in * kh * kw

    # ---- glue: pad + im2col directly in (B, K, HW) layout, in bf16 so the
    # twice-read patches stream costs half the HBM bytes.  Tap order
    # (ci, ky, kx) matches the row-major flatten of the OIHW weight.
    x_bf = x_nchw.astype(jnp.bfloat16)
    xp = jnp.pad(x_bf, ((0, 0), (0, 0), (padding, padding), (padding, padding)))
    taps = [xp[:, ci, ky:ky + H_out, kx:kx + W_out]
            for ci in range(C_in) for ky in range(kh) for kx in range(kw)]
    patches_t = jnp.stack(taps, axis=1).reshape(B, K, HW)

    # Pad spatial only to the lane width (<=127 zero columns), then pick the
    # largest 128-multiple tile that divides it and fits the VMEM budget.
    HWp = _round_up(HW, 128)
    if HWp != HW:
        patches_t = jnp.pad(patches_t, ((0, 0), (0, 0), (0, HWp - HW)))
    t_sp = _choose_spatial_tile(HWp, K, C_out, max_lanes=block_spatial)
    n_sp = HWp // t_sp

    w_bf = weight.reshape(C_out, K).astype(jnp.bfloat16)
    vmem_limit = 32 * 1024 * 1024

    # ---- call A: tiny per-batch Gram / sum statistics (patches read #1).
    g_part, s_part = pl.pallas_call(
        _stats_kernel,
        out_shape=(jax.ShapeDtypeStruct((B, K, K), jnp.float32),
                   jax.ShapeDtypeStruct((B, K, 1), jnp.float32)),
        grid_spec=pltpu.PrefetchScalarGridSpec(
            num_scalar_prefetch=0,
            grid=(B, n_sp),
            in_specs=[pl.BlockSpec((1, K, t_sp), lambda b, s: (b, 0, s))],
            out_specs=(pl.BlockSpec((1, K, K), lambda b, s: (b, 0, 0)),
                       pl.BlockSpec((1, K, 1), lambda b, s: (b, 0, 0))),
        ),
        compiler_params=pltpu.CompilerParams(
            dimension_semantics=("parallel", "arbitrary"),
            vmem_limit_bytes=vmem_limit),
    )(patches_t)

    # ---- fold (plain JAX, (K,K)-sized): channel sums -> per-field mean/var ->
    # per-channel scale/shift.  Uses the bf16-rounded weight so the stats
    # describe exactly the y that kernel B produces.  Zero-padded spatial
    # columns contribute nothing to G/s; the true element count is used.
    w_f32 = w_bf.astype(jnp.float32)                       # (C_out, K)
    g = jnp.sum(g_part, axis=0)                            # (K, K)
    s = jnp.sum(s_part, axis=0)                            # (K, 1)
    ch_sum = jnp.dot(w_f32, s)                             # (C_out, 1)
    ch_sq = jnp.sum(jnp.dot(w_f32, g) * w_f32, axis=1, keepdims=True)
    inv_count = 1.0 / float(B * HW * N)
    f_sum = jnp.sum(ch_sum.reshape(n_channels, N), axis=1)
    f_sq = jnp.sum(ch_sq.reshape(n_channels, N), axis=1)
    mean = f_sum * inv_count
    # Biased training-mode variance E[y^2] - mean^2, clamped at 0 (same
    # formula as InnerBatchNorm; can cancel if |mean| >> std).
    var = jnp.maximum(f_sq * inv_count - mean * mean, 0.0)
    scale_f = gamma.astype(jnp.float32) * jax.lax.rsqrt(var + eps)
    shift_f = beta.astype(jnp.float32) - mean * scale_f
    scale_c = jnp.repeat(scale_f, N).reshape(C_out, 1)
    shift_c = jnp.repeat(shift_f, N).reshape(C_out, 1)

    # ---- call B: conv + BN + ReLU (patches read #2).  Both grid axes are
    # "parallel" so v7x megacore can shard batch/spatial tiles across cores.
    out_t = pl.pallas_call(
        _apply_kernel,
        out_shape=jax.ShapeDtypeStruct((B, C_out, HWp), jnp.float32),
        grid_spec=pltpu.PrefetchScalarGridSpec(
            num_scalar_prefetch=0,
            grid=(B, n_sp),
            in_specs=[
                pl.BlockSpec((1, K, t_sp), lambda b, s: (b, 0, s)),
                pl.BlockSpec((C_out, K), lambda b, s: (0, 0)),
                pl.BlockSpec((C_out, 1), lambda b, s: (0, 0)),
                pl.BlockSpec((C_out, 1), lambda b, s: (0, 0)),
            ],
            out_specs=pl.BlockSpec((1, C_out, t_sp), lambda b, s: (b, 0, s)),
        ),
        compiler_params=pltpu.CompilerParams(
            dimension_semantics=("parallel", "parallel"),
            vmem_limit_bytes=vmem_limit),
    )(patches_t, w_bf, scale_c, shift_c)

    # ---- glue: channel-major already; NCHW output is a (usually free) reshape.
    if HWp != HW:
        out_t = out_t[:, :, :HW]
    return out_t.reshape(B, C_out, H_out, W_out)


def _reference(x, weight, gamma, beta, *, N, padding, eps=1e-5):
    """Pure-JAX reference: conv2d -> per-field training-mode BN -> ReLU."""
    y = jax.lax.conv_general_dilated(
        x.astype(jnp.float32), weight.astype(jnp.float32),
        window_strides=(1, 1),
        padding=((padding, padding), (padding, padding)),
        dimension_numbers=("NCHW", "OIHW", "NCHW"),
        precision=jax.lax.Precision.HIGHEST)
    B, C_out, H_out, W_out = y.shape
    n_ch = C_out // N
    yf = y.reshape(B, n_ch, N, H_out, W_out)
    mean = jnp.mean(yf, axis=(0, 2, 3, 4), keepdims=True)
    var = jnp.maximum(
        jnp.mean(yf * yf, axis=(0, 2, 3, 4), keepdims=True) - mean * mean, 0.0)
    g = gamma.reshape(1, n_ch, 1, 1, 1)
    b = beta.reshape(1, n_ch, 1, 1, 1)
    yn = (yf - mean) * jax.lax.rsqrt(var + eps) * g + b
    return jnp.maximum(yn, 0.0).reshape(B, C_out, H_out, W_out)


if __name__ == "__main__":
    # Module hyper-params (small, consistent with the PyTorch __init__ defaults).
    N = 4                 # rotation order of C_N
    n_channels = 8        # regular-repr fields -> C_out = n_channels * N = 32
    kernel_size = 3
    padding = 1

    B, C_in, H, W = 2, 1, 16, 16   # in_type is the trivial repr -> 1 input channel

    key = jax.random.PRNGKey(0)
    k_x, k_w = jax.random.split(key)
    x = jax.random.normal(k_x, (B, C_in, H, W), jnp.float32)

    C_out = n_channels * N
    weight = 0.1 * jax.random.normal(
        k_w, (C_out, C_in, kernel_size, kernel_size), jnp.float32)
    gamma = jnp.ones((n_channels,), jnp.float32)   # InnerBatchNorm affine init
    beta = jnp.zeros((n_channels,), jnp.float32)

    fwd = functools.partial(so2_on_r2_conv_block, N=N, n_channels=n_channels,
                            padding=padding)
    out = jax.jit(fwd)(x, weight, gamma, beta)
    out = jax.block_until_ready(out)
    assert out.shape == (B, C_out, H, W)

    ref = _reference(x, weight, gamma, beta, N=N, padding=padding)
    ref = jax.block_until_ready(ref)
    err = float(jnp.max(jnp.abs(out - ref) / (1.0 + jnp.abs(ref))))
    assert err < 2e-2, f"mismatch vs reference: {err}"

    print("KERNEL_OK")
</pallas_src>

<mosaic_0001>
module attributes {stable_mosaic.version = 11 : i64} {
  func.func @_stats_kernel(%arg0: i32, %arg1: i32, %arg2: memref<1x9x256xbf16, #tpu.memory_space<vmem>>, %arg3: memref<1x9x9xf32, #tpu.memory_space<vmem>>, %arg4: memref<1x9x1xf32, #tpu.memory_space<vmem>>) attributes {dimension_semantics = [#tpu.dimension_semantics<parallel>, #tpu.dimension_semantics<arbitrary>], iteration_bounds = array<i64: 2, 1>, scalar_prefetch = 0 : i64, scratch_operands = 0 : i64, tpu.core_type = #tpu.core_type<tc>, window_params = [{transform_indices = @transform_0, window_bounds = array<i64: 1, 9, 256>}, {transform_indices = @transform_1, window_bounds = array<i64: 1, 9, 9>}, {transform_indices = @transform_2, window_bounds = array<i64: 1, 9, 1>}]} {
    %c0_i32 = arith.constant 0 : i32
    %0 = arith.cmpi eq, %arg1, %c0_i32 : i32
    %1 = arith.extui %0 : i1 to i32
    %c0_i32_0 = arith.constant 0 : i32
    %2 = arith.cmpi ne, %1, %c0_i32_0 : i32
    scf.if %2 {
      %cst_16 = arith.constant 0.000000e+00 : f32
      %22 = vector.broadcast %cst_16 : f32 to vector<1x9x9xf32>
      %c0_17 = arith.constant 0 : index
      %c0_18 = arith.constant 0 : index
      %c0_19 = arith.constant 0 : index
      %23 = vector.load %arg3[%c0_17, %c0_18, %c0_19] : memref<1x9x9xf32, #tpu.memory_space<vmem>>, vector<1x9x9xf32>
      tpu.vector_store %arg3[%c0_17, %c0_18, %c0_19], %22 {strides = array<i32>} : memref<1x9x9xf32, #tpu.memory_space<vmem>>, vector<1x9x9xf32>,
      %cst_20 = arith.constant 0.000000e+00 : f32
      %24 = vector.broadcast %cst_20 : f32 to vector<1x9x1xf32>
      %c0_21 = arith.constant 0 : index
      %c0_22 = arith.constant 0 : index
      %c0_23 = arith.constant 0 : index
      %25 = vector.load %arg4[%c0_21, %c0_22, %c0_23] : memref<1x9x1xf32, #tpu.memory_space<vmem>>, vector<1x9x1xf32>
      tpu.vector_store %arg4[%c0_21, %c0_22, %c0_23], %24 {strides = array<i32>} : memref<1x9x1xf32, #tpu.memory_space<vmem>>, vector<1x9x1xf32>,
    } else {
    }
    %c0 = arith.constant 0 : index
    %c0_1 = arith.constant 0 : index
    %c0_2 = arith.constant 0 : index
    %3 = vector.load %arg2[%c0, %c0_1, %c0_2] : memref<1x9x256xbf16, #tpu.memory_space<vmem>>, vector<1x9x256xbf16>
    %4 = vector.shape_cast %3 : vector<1x9x256xbf16> to vector<9x256xbf16>
    %5 = arith.extf %4 : vector<9x256xbf16> to vector<9x256xf32>
    %c0_3 = arith.constant 0 : index
    %c0_4 = arith.constant 0 : index
    %c0_5 = arith.constant 0 : index
    %6 = vector.load %arg3[%c0_3, %c0_4, %c0_5] : memref<1x9x9xf32, #tpu.memory_space<vmem>>, vector<1x9x9xf32>
    %7 = vector.shape_cast %6 : vector<1x9x9xf32> to vector<9x9xf32>
    %8 = tpu.transpose %5, [1, 0] : vector<9x256xf32> -> vector<256x9xf32>
    %cst = arith.constant dense<0.000000e+00> : vector<9x9xf32>
    %9 = tpu.matmul %5, %8, %cst {dimension_numbers = #tpu.dot_dimension_numbers<[1], [0], [0], [1], [0, 0, 1, 1], [], []>} : vector<9x256xf32>, vector<256x9xf32>, vector<9x9xf32> -> vector<9x9xf32>
    %10 = arith.addf %7, %9 : vector<9x9xf32>
    %c0_6 = arith.constant 0 : index
    %c0_7 = arith.constant 0 : index
    %c0_8 = arith.constant 0 : index
    %11 = vector.load %arg3[%c0_6, %c0_7, %c0_8] : memref<1x9x9xf32, #tpu.memory_space<vmem>>, vector<1x9x9xf32>
    %12 = vector.shape_cast %11 : vector<1x9x9xf32> to vector<9x9xf32>
    %13 = vector.shape_cast %10 : vector<9x9xf32> to vector<1x9x9xf32>
    tpu.vector_store %arg3[%c0_6, %c0_7, %c0_8], %13 {strides = array<i32>} : memref<1x9x9xf32, #tpu.memory_space<vmem>>, vector<1x9x9xf32>,
    %c0_9 = arith.constant 0 : index
    %c0_10 = arith.constant 0 : index
    %c0_11 = arith.constant 0 : index
    %14 = vector.load %arg4[%c0_9, %c0_10, %c0_11] : memref<1x9x1xf32, #tpu.memory_space<vmem>>, vector<1x9x1xf32>
    %15 = vector.shape_cast %14 : vector<1x9x1xf32> to vector<9x1xf32>
    %cst_12 = arith.constant dense<0.000000e+00> : vector<9xf32>
    %16 = vector.multi_reduction <add>, %5, %cst_12 [1] : vector<9x256xf32> to vector<9xf32>
    %17 = vector.shape_cast %16 : vector<9xf32> to vector<9x1xf32>
    %18 = arith.addf %15, %17 : vector<9x1xf32>
    %c0_13 = arith.constant 0 : index
    %c0_14 = arith.constant 0 : index
    %c0_15 = arith.constant 0 : index
    %19 = vector.load %arg4[%c0_13, %c0_14, %c0_15] : memref<1x9x1xf32, #tpu.memory_space<vmem>>, vector<1x9x1xf32>
    %20 = vector.shape_cast %19 : vector<1x9x1xf32> to vector<9x1xf32>
    %21 = vector.shape_cast %18 : vector<9x1xf32> to vector<1x9x1xf32>
    tpu.vector_store %arg4[%c0_13, %c0_14, %c0_15], %21 {strides = array<i32>} : memref<1x9x1xf32, #tpu.memory_space<vmem>>, vector<1x9x1xf32>,
    return
  }
  func.func @transform_0(%arg0: i32, %arg1: i32) -> (i32, i32, i32) {
    %c0_i32 = arith.constant 0 : i32
    %c0_i32_0 = arith.constant 0 : i32
    return %arg0, %c0_i32, %arg1 : i32, i32, i32
  }
  func.func @transform_1(%arg0: i32, %arg1: i32) -> (i32, i32, i32) {
    %c0_i32 = arith.constant 0 : i32
    %c0_i32_0 = arith.constant 0 : i32
    %c0_i32_1 = arith.constant 0 : i32
    return %arg0, %c0_i32, %c0_i32_0 : i32, i32, i32
  }
  func.func @transform_2(%arg0: i32, %arg1: i32) -> (i32, i32, i32) {
    %c0_i32 = arith.constant 0 : i32
    %c0_i32_0 = arith.constant 0 : i32
    %c0_i32_1 = arith.constant 0 : i32
    return %arg0, %c0_i32, %c0_i32_0 : i32, i32, i32
  }
}

module attributes {stable_mosaic.version = 11 : i64} {
  func.func @_apply_kernel(%arg0: i32, %arg1: i32, %arg2: memref<1x9x256xbf16, #tpu.memory_space<vmem>>, %arg3: memref<32x9xbf16, #tpu.memory_space<vmem>>, %arg4: memref<32x1xf32, #tpu.memory_space<vmem>>, %arg5: memref<32x1xf32, #tpu.memory_space<vmem>>, %arg6: memref<1x32x256xf32, #tpu.memory_space<vmem>>) attributes {dimension_semantics = [#tpu.dimension_semantics<parallel>, #tpu.dimension_semantics<parallel>], iteration_bounds = array<i64: 2, 1>, scalar_prefetch = 0 : i64, scratch_operands = 0 : i64, tpu.core_type = #tpu.core_type<tc>, window_params = [{transform_indices = @transform_0, window_bounds = array<i64: 1, 9, 256>}, {pipeline_mode = #tpu.pipeline_mode<synchronous>, transform_indices = @transform_1, window_bounds = array<i64: 32, 9>}, {pipeline_mode = #tpu.pipeline_mode<synchronous>, transform_indices = @transform_2, window_bounds = array<i64: 32, 1>}, {pipeline_mode = #tpu.pipeline_mode<synchronous>, transform_indices = @transform_3, window_bounds = array<i64: 32, 1>}, {transform_indices = @transform_4, window_bounds = array<i64: 1, 32, 256>}]} {
    %c0 = arith.constant 0 : index
    %c0_0 = arith.constant 0 : index
    %0 = vector.load %arg3[%c0, %c0_0] : memref<32x9xbf16, #tpu.memory_space<vmem>>, vector<32x9xbf16>
    %c0_1 = arith.constant 0 : index
    %c0_2 = arith.constant 0 : index
    %c0_3 = arith.constant 0 : index
    %1 = vector.load %arg2[%c0_1, %c0_2, %c0_3] : memref<1x9x256xbf16, #tpu.memory_space<vmem>>, vector<1x9x256xbf16>
    %2 = vector.shape_cast %1 : vector<1x9x256xbf16> to vector<9x256xbf16>
    %cst = arith.constant dense<0.000000e+00> : vector<32x256xf32>
    %3 = tpu.matmul %0, %2, %cst {dimension_numbers = #tpu.dot_dimension_numbers<[1], [0], [0], [1], [0, 0, 1, 1], [], []>} : vector<32x9xbf16>, vector<9x256xbf16>, vector<32x256xf32> -> vector<32x256xf32>
    %c0_4 = arith.constant 0 : index
    %c0_5 = arith.constant 0 : index
    %4 = vector.load %arg4[%c0_4, %c0_5] : memref<32x1xf32, #tpu.memory_space<vmem>>, vector<32x1xf32>
    %5 = vector.broadcast %4 : vector<32x1xf32> to vector<32x256xf32>
    %6 = arith.mulf %3, %5 : vector<32x256xf32>
    %c0_6 = arith.constant 0 : index
    %c0_7 = arith.constant 0 : index
    %7 = vector.load %arg5[%c0_6, %c0_7] : memref<32x1xf32, #tpu.memory_space<vmem>>, vector<32x1xf32>
    %8 = vector.broadcast %7 : vector<32x1xf32> to vector<32x256xf32>
    %9 = arith.addf %6, %8 : vector<32x256xf32>
    %cst_8 = arith.constant 0.000000e+00 : f32
    %10 = vector.broadcast %cst_8 : f32 to vector<32x256xf32>
    %11 = arith.maximumf %9, %10 : vector<32x256xf32>
    %c0_9 = arith.constant 0 : index
    %c0_10 = arith.constant 0 : index
    %c0_11 = arith.constant 0 : index
    %12 = vector.load %arg6[%c0_9, %c0_10, %c0_11] : memref<1x32x256xf32, #tpu.memory_space<vmem>>, vector<1x32x256xf32>
    %13 = vector.shape_cast %12 : vector<1x32x256xf32> to vector<32x256xf32>
    %14 = vector.shape_cast %11 : vector<32x256xf32> to vector<1x32x256xf32>
    tpu.vector_store %arg6[%c0_9, %c0_10, %c0_11], %14 {strides = array<i32>} : memref<1x32x256xf32, #tpu.memory_space<vmem>>, vector<1x32x256xf32>,
    return
  }
  func.func @transform_0(%arg0: i32, %arg1: i32) -> (i32, i32, i32) {
    %c0_i32 = arith.constant 0 : i32
    %c0_i32_0 = arith.constant 0 : i32
    return %arg0, %c0_i32, %arg1 : i32, i32, i32
  }
  func.func @transform_1(%arg0: i32, %arg1: i32) -> (i32, i32) {
    %c0_i32 = arith.constant 0 : i32
    %c0_i32_0 = arith.constant 0 : i32
    %c0_i32_1 = arith.constant 0 : i32
    return %c0_i32, %c0_i32_0 : i32, i32
  }
  func.func @transform_2(%arg0: i32, %arg1: i32) -> (i32, i32) {
    %c0_i32 = arith.constant 0 : i32
    %c0_i32_0 = arith.constant 0 : i32
    %c0_i32_1 = arith.constant 0 : i32
    return %c0_i32, %c0_i32_0 : i32, i32
  }
  func.func @transform_3(%arg0: i32, %arg1: i32) -> (i32, i32) {
    %c0_i32 = arith.constant 0 : i32
    %c0_i32_0 = arith.constant 0 : i32
    %c0_i32_1 = arith.constant 0 : i32
    return %c0_i32, %c0_i32_0 : i32, i32
  }
  func.func @transform_4(%arg0: i32, %arg1: i32) -> (i32, i32, i32) {
    %c0_i32 = arith.constant 0 : i32
    %c0_i32_0 = arith.constant 0 : i32
    return %arg0, %c0_i32, %arg1 : i32, i32, i32
  }
}

</mosaic_0001>

<bundles_post_ra>
// kernel: so2_on_r2_conv_block.2
= control target key start
LH: loop header
LB: loop body
LE: loop exit
PB: predicated region body
PF: predicated region fallthrough
CT: control target
= control target key end

     0   :  { %s461_s9 = smov 0   ;;  %s463_s10 = smov 0   ;;  %s516_s0 = inlined_call_operand.vmem [shape: bf16[2,9,256], index: 0, kind: input, shape index: {}]   ;;  %s517_s1 = inlined_call_operand.vmem [shape: f32[2,9,9], index: 1, kind: output, shape index: {0}]   ;;  %s518_s2 = inlined_call_operand.vmem [shape: f32[2,9,1], index: 2, kind: output, shape index: {1}]  }
   0x1   :  { %s465_s11 = smov 0  }
   0x2 LB: > { %s25_s12 = sadd.s32 1, %s439_s10  ;;  %p380_p0 = scmp.ge.s32.totalorder %s443_s11, 1  ;;  %s443_s11 = sphi %s465_s11, %s13_s11   ;;  %s439_s10 = sphi %s463_s10, %s520_s10   ;;  %s435_s9 = sphi %s461_s9, %s519_s9  }
   0x3   : > { %p27_p1 = scmp.ge.s32.totalorder %s25_s12, 2  ;;  %p134_p2 = scmp.lt.s32.totalorder %s443_s11, 3 }
   0x5   : > { %s522_s12 = smov (%p27_p1, %s25_s12), 0  ;;  %p135_p3 = pnand %p380_p0, %p134_p2 }
   0x6   : > { %p166_p4 = scmp.lt.s32.totalorder (!%p135_p3), %s435_s9, 1 }
   0x7   : > { %138 = sbr.rel (%p135_p3) target bundleno = 162 (0xa2), region = 24 }
   0xc   : > { %s524_s9 = smov (!%p166_p4, %s435_s9), 1  ;;  %vm193_vm0 = vcmask 7168   ;;  %v445_v2 = vmov 0.0   ;;  %vm262_vm1 = vcmask 1040384   ;;  %vm189_vm2 = vcmask 72704  }
   0xd   : > { %s479_s13 = sshll.u32 %s524_s9, 4  ;;  %vm191_vm3 = vcmask 65536   ;;  %vm195_vm4 = vcmask 0  }
   0xe   : > { %s173_s16 = scalar_lea.vmem %s516_s0, %s479_s13  ;;  %s489_s19 = scalar_lea.vmem %s518_s2, %s479_s13 }
   0xf   : > { %v198_v0 = vld [vmem:[%s173_s16 + $0x8] sm:$0x11]  ;;  %v197_v1 = vld [vmem:[%s173_s16] sm:$0xff]  ;;  %194 = vst.msk [vmem:[%s489_s19] sm:$0xff] %vm193_vm0, %v445_v2  ;;  %s179_s22 = scalar_lea.vmem %s517_s1, %s479_s13 }
  0x10   : > { %v201_v3 = vunpack.c.l.bf16 %v198_v0  ;;  %v202_v4 = vunpack.c.h.bf16 %v198_v0  ;;  %v199_v5 = vunpack.c.l.bf16 %v197_v1  ;;  %v200_v6 = vunpack.c.h.bf16 %v197_v1  ;;  %190 = vst.msk [vmem:[%s179_s22] sm:$0xff] %vm189_vm2, %v445_v2 }
  0x11   : > { %192 = vst.msk [vmem:[%s179_s22 + $0x8] sm:$0x1] %vm191_vm3, %v445_v2 }
  0x12   : > { %392 = vmatpush.xpose.msra.mxu2 %v201_v3  ;;  %394 = vmatpush.xpose.msra.mxu3 %v202_v4  ;;  %v259_v7 = vadd.f32 %v200_v6, %v199_v5  ;;  %v263_v8 = vsel %vm262_vm1, %v201_v3, 0.0  ;;  %v264_v9 = vsel %vm262_vm1, %v202_v4, 0.0  ;;  %196 = vst.msk [vmem:[%s489_s19 + $0x8] sm:$0x1] %vm195_vm4, %v445_v2 }
  0x13   : > { %219 = vmatpush.xpose.msra.mxu0 %v201_v3  ;;  %242 = vmatpush.xpose.msra.mxu1 %v202_v4  ;;  %v265_v10 = vadd.f32 %v264_v9, %v263_v8 }
  0x14   : > { %260 = vadd.xlane.f32.xlu0 %v259_v7 }
  0x16   : > { %393 = vmatpush.xpose.msra.mxu2 %v199_v5  ;;  %395 = vmatpush.xpose.msra.mxu3 %v200_v6  ;;  %v257_v11 = vld [vmem:[%s489_s19] sm:$0xff] }
  0x17   : > { %220 = vmatpush.xpose.msra.mxu0 %v199_v5  ;;  %243 = vmatpush.xpose.msra.mxu1 %v200_v6  ;;  %v203_v18 = vld [vmem:[%s179_s22] sm:$0xff] }
  0x18   : > { %v204_v23 = vld [vmem:[%s179_s22 + $0x8] sm:$0x1] }
  0x19   : > { %224 = vmatmul.f32.vlgmr.msra.gmra.mxu2 %v201_v3  ;;  %247 = vmatmul.f32.vlgmr.msra.gmra.mxu3 %v202_v4  ;;  %v258_v14 = vld [vmem:[%s489_s19 + $0x8] sm:$0x1] }
  0x1a   : > { %221 = vmatmul.f32.vlgmr.msra.gmra.mxu0 %v199_v5  ;;  %244 = vmatmul.f32.vlgmr.msra.gmra.mxu1 %v200_v6 }
  0x1c   : > { %266 = vadd.xlane.f32.xlu0 %v265_v10 }
  0x87   : > { %v261_v12 = vpop.xlane.xlu0 %260 }
  0x88   : > { %v268_v13 = vadd.f32 %v261_v12, %v257_v11 }
  0x8a   : > { %271 = vst.msk [vmem:[%s489_s19] sm:$0xff] %vm193_vm0, %v268_v13 }
  0x8f   : > { %v267_v15 = vpop.xlane.xlu0 %266 }
  0x90   : > { %v269_v16 = vadd.f32 %v267_v15, %v258_v14 }
  0x92   : > { %273 = vst.msk [vmem:[%s489_s19 + $0x8] sm:$0x1] %vm195_vm4, %v269_v16 }
  0x97   : > { %v222_v17 = vpop.f32.mrf.mxu0  ;;  %v245_v19 = vpop.f32.mrf.mxu1 }
  0x98   : > { %v246_v20 = vadd.f32 %v245_v19, %v222_v17 }
  0x9a   : > { %v251_v21 = vadd.f32 %v246_v20, %v203_v18 }
  0x9c   : > { %v225_v22 = vpop.f32.mrf.mxu2  ;;  %254 = vst.msk [vmem:[%s179_s22] sm:$0xff] %vm189_vm2, %v251_v21  ;;  %v248_v24 = vpop.f32.mrf.mxu3 }
  0x9d   : > { %v249_v25 = vadd.f32 %v248_v24, %v225_v22 }
  0x9f   : > { %v252_v26 = vadd.f32 %v249_v25, %v204_v23 }
  0xa1   : > { %256 = vst.msk [vmem:[%s179_s22 + $0x8] sm:$0x1] %vm191_vm3, %v252_v26 }
  0xa2 PF: > { %s13_s11 = sadd.s32 1, %s443_s11   ;;  %s519_s9 = smov %s439_s10 }
  0xa3   : > { %p10_p5 = scmp.ge.s32.totalorder %s13_s11, 4   ;;  %s520_s10 = smov %s522_s12 }
  0xa5   :  { %12 = sbr.rel (!%p10_p5) target bundleno = 2 (0x2), region = 70 }

// kernel: so2_on_r2_conv_block.3
= control target key start
LH: loop header
LB: loop body
LE: loop exit
PB: predicated region body
PF: predicated region fallthrough
CT: control target
= control target key end

     0   :  { %s603_s15 = smov 0   ;;  %s605_s16 = smov 0   ;;  %s680_s0 = inlined_call_operand.vmem [shape: bf16[2,9,256], index: 0, kind: input, shape index: {}]   ;;  %s681_s1 = inlined_call_operand.vmem [shape: bf16[32,9], index: 1, kind: input, shape index: {}]   ;;  %s682_s2 = inlined_call_operand.vmem [shape: f32[32,1], index: 2, kind: input, shape index: {}]   ;;  %s683_s3 = inlined_call_operand.vmem [shape: f32[32,1], index: 3, kind: input, shape index: {}]   ;;  %s684_s4 = inlined_call_operand.vmem [shape: f32[2,32,256], index: 4, kind: output, shape index: {}]  }
   0x1   :  { %s607_s17 = smov 0  }
   0x2 LB: > { %s26_s18 = sadd.s32 1, %s570_s16  ;;  %p488_p0 = scmp.ge.s32.totalorder %s574_s17, 1  ;;  %s574_s17 = sphi %s607_s17, %s14_s17   ;;  %s570_s16 = sphi %s605_s16, %s686_s16   ;;  %s566_s15 = sphi %s603_s15, %s685_s15  }
   0x3   : > { %p28_p1 = scmp.ge.s32.totalorder %s26_s18, 2  ;;  %p183_p2 = scmp.lt.s32.totalorder %s574_s17, 3 }
   0x5   : > { %s688_s18 = smov (%p28_p1, %s26_s18), 0  ;;  %p184_p3 = pnand %p488_p0, %p183_p2 }
   0x6   : > { %p218_p4 = scmp.lt.s32.totalorder (!%p184_p3), %s566_s15, 1 }
   0x7   : > { %187 = sbr.rel (%p184_p3) target bundleno = 172 (0xac), region = 36 }
   0xc   : > { %v319_v0 = vld [vmem:[%s682_s2 + $0x10] sm:$0xff]  ;;  %v317_v1 = vld [vmem:[%s682_s2] sm:$0xff]  ;;  %vm269_vm0 = vcmask 1043456   ;;  %v576_v2 = vmov 0   ;;  %s690_s15 = smov (!%p218_p4, %s566_s15), 1  ;;  %vm270_vm1 = vcmask 1044480  }
   0xd   : > { %550 = vset.pattern.permute.xlu1 %v576_v2  ;;  %549 = vset.pattern.permute.xlu0 %v576_v2  ;;  %v577_v3 = vmov 65535   ;;  %v349_v5 = vld [vmem:[%s683_s3] sm:$0xff]  ;;  %s515_s25 = sshll.u32 %s690_s15, 4  ;;  %v320_v12 = vld [vmem:[%s682_s2 + $0x18] sm:$0xff]  ;;  %v318_v13 = vld [vmem:[%s682_s2 + $0x8] sm:$0xff]  ;;  %vm262_vm2 = vcmask 72704  }
   0xe   : > { %333 = vperm.xlu1 %550, %v319_v0   ;;  %323 = vperm.xlu0 %549, %v317_v1   ;;  %v271_v4 = vsel %vm269_vm0, 4294967295, %v577_v3  ;;  %s225_s28 = scalar_lea.vmem %s680_s0, %s515_s25  ;;  %v517_v17 = vld [vmem:[%s681_s1] sm:$0xff]  ;;  %v518_v18 = vld [vmem:[%s681_s1 + $0x8] sm:$0xff]  ;;  %v352_v20 = vld [vmem:[%s683_s3 + $0x18] sm:$0xff]  ;;  %s516_s21 = sshll.u32 %s690_s15, 6 }
   0xf   : > { %551 = vset.pattern.permute.xlu2 %v576_v2  ;;  %v272_v6 = vsel %vm270_vm1, %v271_v4, 0  ;;  %v503_v7 = vld [vmem:[%s225_s28] sm:$0xf]  ;;  %v520_v8 = vld [vmem:[%s225_s28 + $0x4] sm:$0x10]  ;;  %v351_v21 = vld [vmem:[%s683_s3 + $0x10] sm:$0xff]  ;;  %s661_s24 = scalar_lea.vmem %s684_s4, %s516_s21 }
  0x10   : > { %355 = vperm.xlu2 %551, %v349_v5   ;;  %v519_v9 = vld [vmem:[%s225_s28 + $0x4] sm:$0xf]  ;;  %v504_v10 = vor.u32 %v520_v8, %v503_v7  ;;  %v505_v11 = vld [vmem:[%s225_s28 + $0x8] sm:$0x10] }
  0x11   : > { %v508_v14 = vor.u32 %v519_v9, %v505_v11  ;;  %v350_v19 = vld [vmem:[%s683_s3 + $0x8] sm:$0xff] }
  0x12   : > { %v274_v15 = vand.u32 %v504_v10, %v272_v6 }
  0x13   : > { %v277_v16 = vand.u32 %v508_v14, %v272_v6 }
  0x14   : > { %286 = vmatpush.bf16.msra.mxu0 %v274_v15  ;;  %521 = vmatpush.bf16.msra.mxu2 %v274_v15 }
  0x15   : > { %305 = vmatpush.bf16.msra.mxu1 %v277_v16  ;;  %522 = vmatpush.bf16.msra.mxu3 %v277_v16 }
  0x16   : > { %338 = vperm.xlu1 %550, %v320_v12   ;;  %328 = vperm.xlu0 %549, %v318_v13  }
  0x17   : > { %509 = vmatmul.msk.bf16.vlgmr.msra.gmra.mxu0 %vm262_vm2, %v517_v17  ;;  %510 = vmatmul.msk.bf16.vlgmr.msra.gmra.mxu2 %vm262_vm2, %v518_v18 }
  0x18   : > { %360 = vperm.xlu2 %551, %v350_v19   ;;  %511 = vmatmul.msk.bf16.vlgmr.msra.gmra.mxu1 %vm262_vm2, %v517_v17 }
  0x19   : > { %512 = vmatmul.msk.bf16.vlgmr.msra.gmra.mxu3 %vm262_vm2, %v518_v18 }
  0x1e   : > { %370 = vperm.xlu1 %550, %v352_v20   ;;  %365 = vperm.xlu0 %549, %v351_v21  }
  0x6a   : > { %v356_v25 = vpop.permute.xlu2 %355 }
  0x72   : > { %v361_v45 = vpop.permute.xlu2 %360 }
  0x80   : > { %v324_v22 = vpop.permute.xlu0 %323  ;;  %v334_v23 = vpop.permute.xlu1 %333 }
  0x88   : > { %v329_v24 = vpop.permute.xlu0 %328  ;;  %v339_v33 = vpop.permute.xlu1 %338 }
  0x90   : > { %v366_v38 = vpop.permute.xlu0 %365  ;;  %v371_v56 = vpop.permute.xlu1 %370 }
  0x94   : > { %v288_v26 = vpop.f32.mrf.mxu0 }
  0x95   : > { %v341_v27 = vmul.f32 %v324_v22, %v288_v26  ;;  %v307_v28 = vpop.f32.mrf.mxu1 }
  0x96   : > { %v342_v29 = vmul.f32 %v324_v22, %v307_v28 }
  0x97   : > { %v373_v30 = vadd.f32 %v356_v25, %v341_v27 }
  0x98   : > { %v374_v31 = vadd.f32 %v356_v25, %v342_v29 }
  0x99   : > { %v381_v32 = vmax.f32 %v373_v30, 0.0 }
  0x9a   : > { %v382_v34 = vmax.f32 %v374_v31, 0.0  ;;  %v293_v35 = vpop.f32.mrf.mxu2 }
  0x9b   : > { %389 = vst [vmem:[%s661_s24] sm:$0xff] %v381_v32  ;;  %v345_v36 = vmul.f32 %v334_v23, %v293_v35 }
  0x9c   : > { %v312_v37 = vpop.f32.mrf.mxu3  ;;  %390 = vst [vmem:[%s661_s24 + $0x8] sm:$0xff] %v382_v34  ;;  %v290_v40 = vpop.f32.mrf.mxu0 }
  0x9d   : > { %v346_v39 = vmul.f32 %v334_v23, %v312_v37  ;;  %v377_v41 = vadd.f32 %v366_v38, %v345_v36  ;;  %v343_v42 = vmul.f32 %v329_v24, %v290_v40  ;;  %v309_v43 = vpop.f32.mrf.mxu1 }
  0x9e   : > { %v344_v46 = vmul.f32 %v329_v24, %v309_v43 }
  0x9f   : > { %v378_v44 = vadd.f32 %v366_v38, %v346_v39  ;;  %v385_v47 = vmax.f32 %v377_v41, 0.0  ;;  %v375_v48 = vadd.f32 %v361_v45, %v343_v42 }
  0xa0   : > { %v376_v50 = vadd.f32 %v361_v45, %v344_v46 }
  0xa1   : > { %v386_v49 = vmax.f32 %v378_v44, 0.0  ;;  %393 = vst [vmem:[%s661_s24 + $0x20] sm:$0xff] %v385_v47  ;;  %v383_v51 = vmax.f32 %v375_v48, 0.0 }
  0xa2   : > { %v384_v52 = vmax.f32 %v376_v50, 0.0  ;;  %v295_v53 = vpop.f32.mrf.mxu2 }
  0xa3   : > { %394 = vst [vmem:[%s661_s24 + $0x28] sm:$0xff] %v386_v49  ;;  %v347_v54 = vmul.f32 %v339_v33, %v295_v53 }
  0xa4   : > { %391 = vst [vmem:[%s661_s24 + $0x10] sm:$0xff] %v383_v51  ;;  %v314_v55 = vpop.f32.mrf.mxu3 }
  0xa5   : > { %392 = vst [vmem:[%s661_s24 + $0x18] sm:$0xff] %v384_v52  ;;  %v348_v57 = vmul.f32 %v339_v33, %v314_v55  ;;  %v379_v58 = vadd.f32 %v371_v56, %v347_v54 }
  0xa7   : > { %v380_v59 = vadd.f32 %v371_v56, %v348_v57  ;;  %v387_v60 = vmax.f32 %v379_v58, 0.0 }
  0xa9   : > { %v388_v61 = vmax.f32 %v380_v59, 0.0  ;;  %395 = vst [vmem:[%s661_s24 + $0x30] sm:$0xff] %v387_v60 }
  0xab   : > { %396 = vst [vmem:[%s661_s24 + $0x38] sm:$0xff] %v388_v61 }
  0xac PF: > { %s14_s17 = sadd.s32 1, %s574_s17   ;;  %s685_s15 = smov %s570_s16 }
  0xad   : > { %p11_p5 = scmp.ge.s32.totalorder %s14_s17, 4   ;;  %s686_s16 = smov %s688_s18 }
  0xaf   :  { %13 = sbr.rel (!%p11_p5) target bundleno = 2 (0x2), region = 66 }

</bundles_post_ra>
